<compile_context>
chip_gen: v7x
topology: tpu7x:2x2x1
jax: 0.10.0
libtpu: 0.0.40
codegen_flags: <defaults>
</compile_context>

<pallas_src>
import jax
import jax.numpy as jnp
from jax import lax
from jax.experimental import pallas as pl
from jax.experimental.pallas import tpu as pltpu

_CLAMP_MIN = 1e-12
_CLAMP_MAX = 1e12   # torch: clamp(min=1e-12, max=1000000000000.0)


def _pick_b_tile(b, max_tile=512):
    """Largest convenient B tile (multiple of 8) dividing B; else the full B."""
    for tb in (512, 256, 128, 64, 32, 16, 8):
        if tb <= max_tile and b % tb == 0:
            return tb
    return b  # odd / tiny batch: single tile covering all rows (== full dim)


# --------------------------------------------------------------------------
# Primary path: centers resident in VMEM, label gather via one-hot MXU matmul.
# --------------------------------------------------------------------------
def _center_loss_vmem_kernel(x_ref,        # VMEM (TB, D)  feature tile
                             labels_ref,   # VMEM (TB, 1)  int32 labels tile
                             centers_ref,  # VMEM (C, D)   full centers (resident)
                             rowdist_ref): # VMEM (TB, 1)  f32 clamped row dist
    tb = x_ref.shape[0]
    c = centers_ref.shape[0]

    x = x_ref[...].astype(jnp.float32)
    centers = centers_ref[...].astype(jnp.float32)
    lbl = labels_ref[...]                                       # (TB, 1) int32

    # one_hot[i, k] = (labels[i] == k)  -> gathered[i] = centers[labels[i]]
    class_ids = lax.broadcasted_iota(jnp.int32, (tb, c), 1)     # (TB, C)
    onehot = (lbl == class_ids).astype(jnp.float32)             # (TB, C)
    gathered = jnp.dot(onehot, centers,
                       preferred_element_type=jnp.float32)      # (TB, D) via MXU

    diff = x - gathered
    row = jnp.sum(diff * diff, axis=1, keepdims=True)           # (TB, 1)
    rowdist_ref[...] = jnp.clip(row, _CLAMP_MIN, _CLAMP_MAX)


def _center_loss_vmem(x, centers, labels_i32):
    b, d = x.shape
    c = centers.shape[0]
    tb = _pick_b_tile(b)
    nb = b // tb
    labels2d = labels_i32.reshape(b, 1)

    cost = pl.CostEstimate(
        flops=2 * b * c * d + 3 * b * d,
        transcendentals=0,
        bytes_accessed=int(x.size * x.dtype.itemsize
                           + centers.size * centers.dtype.itemsize
                           + 4 * b + 4 * b),
    )

    return pl.pallas_call(
        _center_loss_vmem_kernel,
        out_shape=jax.ShapeDtypeStruct((b, 1), jnp.float32),
        grid=(nb,),
        in_specs=[
            pl.BlockSpec((tb, d), lambda i: (i, 0)),   # x tile (pipelined)
            pl.BlockSpec((tb, 1), lambda i: (i, 0)),   # labels tile
            pl.BlockSpec((c, d), lambda i: (0, 0)),    # centers: resident, one DMA
        ],
        out_specs=pl.BlockSpec((tb, 1), lambda i: (i, 0)),
        compiler_params=pltpu.CompilerParams(dimension_semantics=("parallel",)),
        cost_estimate=cost,
    )(x, labels2d, centers)


# --------------------------------------------------------------------------
# Fallback path (huge num_classes): centers stay in HBM, per-row DMA gather
# driven by scalar-prefetched labels in SMEM.  Only B center rows ever move.
# --------------------------------------------------------------------------
def _center_loss_hbm_kernel(labels_ref,    # SMEM (B,) int32 (scalar prefetch)
                            x_ref,         # VMEM (TB, D)
                            centers_ref,   # ANY/HBM (C, D)
                            rowdist_ref,   # VMEM (TB, 1) f32
                            gbuf_ref,      # VMEM (TB, D) gathered center rows
                            copy_sems):    # DMA semaphores (TB,)
    tb, _ = x_ref.shape
    base = pl.program_id(0) * tb

    @pl.loop(0, tb)
    def _issue(j):
        lbl = labels_ref[base + j]
        pltpu.make_async_copy(
            centers_ref.at[pl.ds(lbl, 1)],   # (1, D) row of centers in HBM
            gbuf_ref.at[pl.ds(j, 1)],        # (1, D) row of gather buffer
            copy_sems.at[j],
        ).start()

    @pl.loop(0, tb)
    def _wait(j):
        pltpu.make_async_copy(
            centers_ref.at[pl.ds(0, 1)],     # src only used for shape in wait()
            gbuf_ref.at[pl.ds(j, 1)],
            copy_sems.at[j],
        ).wait()

    x = x_ref[...].astype(jnp.float32)
    cg = gbuf_ref[...].astype(jnp.float32)
    diff = x - cg
    row = jnp.sum(diff * diff, axis=1, keepdims=True)
    rowdist_ref[...] = jnp.clip(row, _CLAMP_MIN, _CLAMP_MAX)


def _center_loss_hbm(x, centers, labels_i32):
    b, d = x.shape
    tb = _pick_b_tile(b, max_tile=128)
    nb = b // tb

    grid_spec = pltpu.PrefetchScalarGridSpec(
        num_scalar_prefetch=1,                 # labels -> SMEM
        grid=(nb,),
        in_specs=[
            pl.BlockSpec((tb, d), lambda i, labels: (i, 0)),   # x tile
            pl.BlockSpec(memory_space=pl.ANY),                 # centers stay in HBM
        ],
        out_specs=pl.BlockSpec((tb, 1), lambda i, labels: (i, 0)),
        scratch_shapes=[
            pltpu.VMEM((tb, d), centers.dtype),
            pltpu.SemaphoreType.DMA((tb,)),
        ],
    )

    cost = pl.CostEstimate(
        flops=4 * b * d,
        transcendentals=0,
        bytes_accessed=int(2 * x.size * x.dtype.itemsize + 4 * b + 4 * b),
    )

    return pl.pallas_call(
        _center_loss_hbm_kernel,
        out_shape=jax.ShapeDtypeStruct((b, 1), jnp.float32),
        grid_spec=grid_spec,
        compiler_params=pltpu.CompilerParams(dimension_semantics=("parallel",)),
        cost_estimate=cost,
    )(labels_i32, x, centers)


# --------------------------------------------------------------------------
# Public entry point.
# --------------------------------------------------------------------------
def center_loss(x, centers, labels, *, vmem_centers_byte_limit=8 * 1024 * 1024):
    """Pallas TPU forward of CenterLoss.

    x: (B, D) float, centers: (C, D) float, labels: (B,) int -> scalar f32 loss.
    """
    b, _ = x.shape
    c = centers.shape[0]
    labels_i32 = labels.astype(jnp.int32).reshape(b)

    centers_bytes = centers.size * jnp.dtype(centers.dtype).itemsize
    if centers_bytes <= vmem_centers_byte_limit:
        row_dist = _center_loss_vmem(x, centers, labels_i32)
    else:
        row_dist = _center_loss_hbm(x, centers, labels_i32)

    # PyTorch clamps the B*(C-1) masked-out zeros of distmat up to 1e-12 before
    # summing; add that constant back analytically to keep identical semantics.
    masked_const = jnp.float32(b) * jnp.float32(c - 1) * jnp.float32(_CLAMP_MIN)
    return (jnp.sum(row_dist) + masked_const) / jnp.float32(b)


def center_loss_ref(x, centers, labels):
    """Pure-JAX reference mirroring the PyTorch forward (distmat formulation)."""
    b = x.shape[0]
    c = centers.shape[0]
    distmat = (
        jnp.sum(x ** 2, axis=1, keepdims=True)
        + jnp.sum(centers ** 2, axis=1, keepdims=True).T
        - 2.0 * x @ centers.T
    )
    mask = (labels[:, None] == jnp.arange(c)[None, :]).astype(jnp.float32)
    dist = jnp.clip(distmat * mask, _CLAMP_MIN, _CLAMP_MAX)
    return jnp.sum(dist) / b


if __name__ == "__main__":
    num_classes = 10
    feat_dim = 16
    batch_size = 8

    key = jax.random.PRNGKey(0)
    k_x, k_c, k_l = jax.random.split(key, 3)

    x = jax.random.normal(k_x, (batch_size, feat_dim), dtype=jnp.float32)
    # deterministic stand-in for torch.randn(num_classes, feat_dim) parameter init
    centers = jax.random.normal(k_c, (num_classes, feat_dim), dtype=jnp.float32)
    labels = jax.random.randint(k_l, (batch_size,), 0, num_classes, dtype=jnp.int32)

    ref = center_loss_ref(x, centers, labels)

    # Primary path: centers resident in VMEM, one-hot MXU gather.
    loss_small = jax.block_until_ready(center_loss(x, centers, labels))
    assert jnp.allclose(loss_small, ref, rtol=1e-4, atol=1e-5), (loss_small, ref)

    # Fallback path (forced): centers left in HBM, per-row DMA gather.
    row_dist_hbm = jax.block_until_ready(
        _center_loss_hbm(x, centers, labels.astype(jnp.int32)))
    loss_large = (jnp.sum(row_dist_hbm)
                  + jnp.float32(batch_size) * jnp.float32(num_classes - 1)
                  * jnp.float32(_CLAMP_MIN)) / jnp.float32(batch_size)
    loss_large = jax.block_until_ready(loss_large)
    assert jnp.allclose(loss_large, ref, rtol=1e-4, atol=1e-5), (loss_large, ref)

    print("KERNEL_OK")
</pallas_src>

<mosaic_0001>
module attributes {stable_mosaic.version = 11 : i64} {
  func.func @_center_loss_vmem_kernel(%arg0: i32, %arg1: memref<8x16xf32, #tpu.memory_space<vmem>>, %arg2: memref<8x1xi32, #tpu.memory_space<vmem>>, %arg3: memref<10x16xf32, #tpu.memory_space<vmem>>, %arg4: memref<8x1xf32, #tpu.memory_space<vmem>>) attributes {dimension_semantics = [#tpu.dimension_semantics<parallel>], iteration_bounds = array<i64: 1>, scalar_prefetch = 0 : i64, scratch_operands = 0 : i64, tpu.core_type = #tpu.core_type<tc>, window_params = [{transform_indices = @transform_0, window_bounds = array<i64: 8, 16>}, {transform_indices = @transform_1, window_bounds = array<i64: 8, 1>}, {pipeline_mode = #tpu.pipeline_mode<synchronous>, transform_indices = @transform_2, window_bounds = array<i64: 10, 16>}, {transform_indices = @transform_3, window_bounds = array<i64: 8, 1>}]} {
    %c0 = arith.constant 0 : index
    %c0_0 = arith.constant 0 : index
    %0 = vector.load %arg1[%c0, %c0_0] : memref<8x16xf32, #tpu.memory_space<vmem>>, vector<8x16xf32>
    %c0_1 = arith.constant 0 : index
    %c0_2 = arith.constant 0 : index
    %1 = vector.load %arg3[%c0_1, %c0_2] : memref<10x16xf32, #tpu.memory_space<vmem>>, vector<10x16xf32>
    %c0_3 = arith.constant 0 : index
    %c0_4 = arith.constant 0 : index
    %2 = vector.load %arg2[%c0_3, %c0_4] : memref<8x1xi32, #tpu.memory_space<vmem>>, vector<8x1xi32>
    %3 = tpu.iota {dimensions = array<i32: 1>} : vector<8x10xi32>
    %4 = vector.broadcast %2 : vector<8x1xi32> to vector<8x10xi32>
    %5 = arith.cmpi eq, %4, %3 : vector<8x10xi32>
    %6 = arith.extui %5 : vector<8x10xi1> to vector<8x10xi32>
    %7 = arith.sitofp %6 : vector<8x10xi32> to vector<8x10xf32>
    %cst = arith.constant dense<0.000000e+00> : vector<8x16xf32>
    %8 = tpu.matmul %7, %1, %cst {dimension_numbers = #tpu.dot_dimension_numbers<[1], [0], [0], [1], [0, 0, 1, 1], [], []>} : vector<8x10xf32>, vector<10x16xf32>, vector<8x16xf32> -> vector<8x16xf32>
    %9 = arith.subf %0, %8 : vector<8x16xf32>
    %10 = arith.mulf %9, %9 : vector<8x16xf32>
    %cst_5 = arith.constant dense<0.000000e+00> : vector<8xf32>
    %11 = vector.multi_reduction <add>, %10, %cst_5 [1] : vector<8x16xf32> to vector<8xf32>
    %12 = vector.shape_cast %11 : vector<8xf32> to vector<8x1xf32>
    %cst_6 = arith.constant 9.99999996E-13 : f32
    %cst_7 = arith.constant 9.99999995E+11 : f32
    %13 = vector.broadcast %cst_6 : f32 to vector<8x1xf32>
    %14 = arith.maximumf %13, %12 : vector<8x1xf32>
    %15 = vector.broadcast %cst_7 : f32 to vector<8x1xf32>
    %16 = arith.minimumf %15, %14 : vector<8x1xf32>
    %c0_8 = arith.constant 0 : index
    %c0_9 = arith.constant 0 : index
    %17 = vector.load %arg4[%c0_8, %c0_9] : memref<8x1xf32, #tpu.memory_space<vmem>>, vector<8x1xf32>
    tpu.vector_store %arg4[%c0_8, %c0_9], %16 {strides = array<i32>} : memref<8x1xf32, #tpu.memory_space<vmem>>, vector<8x1xf32>,
    return
  }
  func.func @transform_0(%arg0: i32) -> (i32, i32) {
    %c0_i32 = arith.constant 0 : i32
    %c0_i32_0 = arith.constant 0 : i32
    return %arg0, %c0_i32 : i32, i32
  }
  func.func @transform_1(%arg0: i32) -> (i32, i32) {
    %c0_i32 = arith.constant 0 : i32
    %c0_i32_0 = arith.constant 0 : i32
    return %arg0, %c0_i32 : i32, i32
  }
  func.func @transform_2(%arg0: i32) -> (i32, i32) {
    %c0_i32 = arith.constant 0 : i32
    %c0_i32_0 = arith.constant 0 : i32
    %c0_i32_1 = arith.constant 0 : i32
    return %c0_i32, %c0_i32_0 : i32, i32
  }
  func.func @transform_3(%arg0: i32) -> (i32, i32) {
    %c0_i32 = arith.constant 0 : i32
    %c0_i32_0 = arith.constant 0 : i32
    return %arg0, %c0_i32 : i32, i32
  }
}

</mosaic_0001>

<bundles_post_ra>
// kernel: tpu_custom_call.1
= control target key start
LH: loop header
LB: loop body
LE: loop exit
PB: predicated region body
PF: predicated region fallthrough
CT: control target
= control target key end

     0   :  { %8 = vsyncpa [#allocation3], 0  ;;  %s179_s12 = smov [#allocation2]   ;;  %s229_s0 = inlined_call_operand.hbm [shape: f32[8,16], index: 0, kind: input, shape index: {}]   ;;  %s230_s1 = inlined_call_operand.vmem [shape: s32[8,1], index: 1, kind: input, shape index: {}]   ;;  %s231_s2 = inlined_call_operand.vmem [shape: f32[10,16], index: 2, kind: input, shape index: {}]   ;;  %s232_s3 = inlined_call_operand.vmem [shape: f32[8,1], index: 3, kind: output, shape index: {}]  }
   0x1   :  { %s15_s13 = sshll.u32 %s179_s12, 4  ;;  %s155_s16 = scalar_lea.hbm %s229_s0, 128  ;;  %s16_s13 = int_to_ptr.vmem [resolvable:$true] %s15_s13 }
   0x2   :  { %p156_p0 = scmp.ne.s32.totalorder %s229_s0, %s155_s16  ;;  %p159_p1 = scmp.lt.u32.totalorder %s155_s16, %s229_s0 }
   0x4   :  { %p161_p2 = pnand %p159_p1, %p156_p0 }
   0x6   :  { %164 = shalt.err (!%p161_p2)
}
   0x7   :  { %s165_s21 = scalar_lea.vmem %s16_s13, 128  ;;  %p170_p4 = scmp.lt.s32.totalorder %s16_s13, %s16_s13 }
   0x8   :  { %p166_p3 = scmp.ne.s32.totalorder %s16_s13, %s165_s21  ;;  %p171_p5 = scmp.lt.s32.totalorder %s165_s21, %s165_s21 }
   0xa   :  { %p172_p6 = por %p171_p5, %p170_p4 }
   0xc   :  { %p173_p7 = pnand %p172_p6, %p166_p3 }
   0xe   :  { %176 = shalt.err (!%p173_p7)
}
   0xf   :  { %18 = dma.hbm_to_vmem [thread:$0]  %s229_s0, 128, %s16_s13, [#allocation3]  }
  0x10   :  { %177 = dma.done.wait [#allocation3], 128  }
  0x11   :  { %178 = vsyncadd [#allocation3], 4294967168  ;;  %v180_v0 = vmov 0   ;;  %v181_v1 = vmov 0.0|0.0   ;;  %vm42_vm0 = vcmask 1041408   ;;  %vm182_vm1 = vmmov 1  }
  0x12   :  { %154 = vset.pattern.permute.xlu0 %v180_v0  ;;  %144 = vmatprep.subr.bf16.mxu0 %v181_v1  ;;  %vm146_vm2 = vmpackc.low %vm42_vm0, %vm182_vm1  ;;  %v29_v2 = vld [vmem:[%s230_s1] sm:$0xff]  ;;  %v28_v4 = vld [vmem:[%s231_s2 + $0x8] sm:$0x3]  ;;  %vm183_vm3 = vmmov 0   ;;  %v184_v6 = vmov 0.0   ;;  %v30_v7 = vlaneseq  ;;  %vm38_vm4 = vcmask 80896  }
  0x13   :  { %v27_v3 = vld [vmem:[%s231_s2] sm:$0xff]  ;;  %33 = vperm.xlu0 %154, %v29_v2   ;;  %141 = vmatprep.mubr.msk.f32.mxu0 %vm183_vm3, %v184_v6  ;;  %vm118_vm6 = vcmask 130048   ;;  %vm124_vm7 = vcmask 7168  }
  0x14   :  { %v145_v5 = vpack.c.bf16 %v28_v4, %v27_v3  ;;  %v31_v8 = vand.u32 127, %v30_v7  ;;  %v26_v11 = vld [vmem:[#allocation2] sm:$0xff] }
  0x16   :  { %147 = vmatpush3.bf16.msk.msra.mxu0 %vm146_vm2, %v145_v5 }
  0x92   :  { %v34_v9 = vpop.permute.xlu0 %33 }
  0x93   :  { %vm35_vm5 = vcmp.eq.s32.totalorder %v34_v9, %v31_v8 }
  0x94   :  { %v131_v10 = vsel %vm35_vm5, 1.0, %v184_v6 }
  0x95   :  { %142 = vmatmul.mubr.msk.f32.vlgmr.msra.gmra.mrb[0].mxu0 %vm38_vm4, %v131_v10 }
 0x168   :  { %v112_v12 = vpop.f32.mrb[0].mxu0 }
 0x169   :  { %v116_v13 = vsub.f32 %v26_v11, %v112_v12  ;;  %v143_v14 = vpop.f32.mrb[1].mxu0 }
 0x16b   :  { %v117_v15 = vmul.f32 %v116_v13, %v116_v13 }
 0x16d   :  { %v119_v16 = vsel %vm118_vm6, %v117_v15, 0.0 }
 0x16e   :  { %120 = vadd.xlane.f32.xlu0 %v119_v16 }
 0x1fb   :  { %v121_v17 = vpop.xlane.xlu0 %120 }
 0x1fc   :  { %v122_v18 = vmax.f32 %v121_v17, 1e-12 }
 0x1fe   :  { %v123_v19 = vmin.f32 %v122_v18, 1e+12 }
 0x200   :  { %125 = vst.msk [vmem:[%s232_s3] sm:$0xff] %vm124_vm7, %v123_v19 }
 0x201   :  { %130 = vsyncpa [#allocation3], 1 }

</bundles_post_ra>
